<compile_context>
chip_gen: v6e
topology: v6e:2x2x1
jax: 0.10.0
libtpu: 0.0.40
codegen_flags: <defaults>
</compile_context>

<pallas_src>
import functools
import math

import jax
import jax.numpy as jnp
import numpy as np
from jax import lax
from jax.experimental import pallas as pl
from jax.experimental.pallas import tpu as pltpu


def _intra_p_to_p_kernel(c_blk_ref, ct_ref, inv_row_ref, inv_col_ref, out_ref,
                         *, class_num, block_rows):
    """One row block of the cluster-contrastive cross-entropy.

    c_blk_ref   : (TR, B_pad)  rows [r*TR, (r+1)*TR) of c = [c_i^T ; c_j^T]
    ct_ref      : (B_pad, N)   c^T, resident across the grid
    inv_row_ref : (TR, 1)      1/||c_row||            (precomputed in wrapper)
    inv_col_ref : (1, N)       1/(||c_col|| * temp)   (precomputed in wrapper)
    out_ref     : (TR, 128)    per-row (lse_i - pos_i), lane-broadcast
    """
    K = class_num
    N = 2 * K
    TR = block_rows
    r = pl.program_id(0)

    cb = c_blk_ref[...]                                           # (TR, B_pad)
    ct = ct_ref[...]                                              # (B_pad, N)

    # Cosine similarity / temperature for this row block vs all rows.
    # Gram on the MXU; the norm factors arrive precomputed (hoisted out of the
    # grid), so only two cheap VPU broadcasts remain per step.
    gram = jnp.dot(cb, ct, preferred_element_type=jnp.float32)    # (TR, N)
    sim = gram * inv_row_ref[...] * inv_col_ref[...]              # (TR, N)

    row_g = r * TR + lax.broadcasted_iota(jnp.int32, (TR, 1), 0)  # global row id
    col_g = lax.broadcasted_iota(jnp.int32, (1, N), 1)            # global col id

    # Positive logit straight from the sim tile: pos_i = sim[i, pair(i)],
    # pair(i) = i + K (i < K) else i - K.  Exactly one hit per row.
    pair_col = jnp.where(row_g < K, row_g + K, row_g - K)
    pos = jnp.sum(jnp.where(col_g == pair_col, sim, jnp.float32(0.0)),
                  axis=1, keepdims=True)                          # (TR, 1)

    # Cross-entropy term: logits_i = {pos_i} U {sim[i, j] : j != i, j != pair(i)}
    #                               = {sim[i, j] : j != i}
    # so per-row loss = logsumexp_{j != i} sim[i, j] - pos_i.
    sim_m = jnp.where(row_g == col_g, jnp.float32(-1e30), sim)
    m = jnp.max(sim_m, axis=1, keepdims=True)                     # (TR, 1)
    lse = m + jnp.log(jnp.sum(jnp.exp(sim_m - m), axis=1, keepdims=True))

    # Lane-dense per-row output; the wrapper sums column 0 and divides by N.
    out_ref[...] = jnp.broadcast_to(lse - pos, (TR, 128))


def _pick_block_rows(N, B_pad):
    """Row-block size TR.  Must divide N (or equal it) and be a sublane multiple."""
    # Single-step fast path: whole problem resident in VMEM.  Typical class_num
    # for this loss is small, so this is the common case.
    single_step_bytes = 4 * (3 * N * B_pad + 8 * N * N)
    if single_step_bytes <= 8 * 1024 * 1024:
        return N
    # Tiled path.  Cap at 128 rows: fills the v5e MXU (4x128x128) and keeps the
    # (TR, N) temporaries / double buffers comfortable inside v7x's 64 MiB VMEM.
    for cand in (128, 64, 32, 16, 8):
        if N % cand == 0:
            return cand
    # TODO(synk): class_num not a multiple of 4 and too large for one block
    # would need padding the cluster axis with masked dummy clusters.
    return N


def intra_p_to_p(c_i, c_j, class_num, temperature):
    """Pallas forward of Intra_p_to_p: returns (loss, ne_loss)."""
    B, K = c_i.shape
    assert K == class_num
    N = 2 * K

    c_i = c_i.astype(jnp.float32)
    c_j = c_j.astype(jnp.float32)

    # ---- negative-entropy regularizer: a handful of scalars, plain XLA ------
    p_i = jnp.sum(c_i, axis=0)
    p_i = p_i / jnp.sum(p_i)
    ne_i = jnp.float32(math.log(K)) + jnp.sum(p_i * jnp.log(p_i))
    p_j = jnp.sum(c_j, axis=0)
    p_j = p_j / jnp.sum(p_j)
    ne_j = jnp.float32(math.log(K)) + jnp.sum(p_j * jnp.log(p_j))
    ne_loss = ne_i + ne_j

    # ---- layout glue (pure XLA, outside the hot kernel) ---------------------
    # c = [c_i^T ; c_j^T], batch/contraction axis zero-padded to a lane multiple
    # (zeros change neither the gram matrix nor the norms).
    c = jnp.concatenate([c_i.T, c_j.T], axis=0)                     # (N, B)
    B_pad = ((B + 127) // 128) * 128
    if B_pad != B:
        c = jnp.pad(c, ((0, 0), (0, B_pad - B)))
    c_t = c.T                                                       # (B_pad, N)

    # Hoisted inverse norms (review item 1).  eps note: torch.CosineSimilarity
    # clamps the *product* ||a||*||b|| at 1e-8; clamping each squared norm at
    # 1e-8 matches it for all non-degenerate rows (softmax outputs).
    # TODO(synk): exact product-clamp semantics for near-zero-mass clusters.
    nsq = jnp.sum(c * c, axis=1)                                    # (N,)
    inv_norm = lax.rsqrt(jnp.maximum(nsq, jnp.float32(1e-8)))       # (N,)
    inv_row = inv_norm.reshape(N, 1)                                # (N, 1)
    inv_col = (inv_norm * jnp.float32(1.0 / temperature)).reshape(1, N)

    TR = _pick_block_rows(N, B_pad)
    n_blocks = N // TR

    kernel = functools.partial(
        _intra_p_to_p_kernel, class_num=K, block_rows=TR)

    # VMEM budget derived from actual buffer sizes, capped at 48 MiB so there
    # is headroom inside v7x's 64 MiB per-TC VMEM (v5e/v6e have 128 MiB).
    vmem_needed = 4 * (2 * TR * B_pad        # double-buffered row block
                       + 2 * B_pad * N       # resident c^T (conservatively x2)
                       + 8 * TR * N          # sim / mask / exp temporaries
                       + 2 * TR * 128 + N)   # output block + norm vectors
    vmem_limit = int(min(max(vmem_needed, 16 * 1024 * 1024), 48 * 1024 * 1024))

    out = pl.pallas_call(
        kernel,
        out_shape=jax.ShapeDtypeStruct((N, 128), jnp.float32),
        grid=(n_blocks,),
        in_specs=[
            # current row block of c
            pl.BlockSpec((TR, B_pad), lambda r: (r, 0)),
            # c^T, full array, resident across the grid (index_map is constant)
            pl.BlockSpec((B_pad, N), lambda r: (0, 0)),
            # precomputed row inverse norms (per-block slice)
            pl.BlockSpec((TR, 1), lambda r: (r, 0)),
            # precomputed column inverse norms * 1/temperature (resident)
            pl.BlockSpec((1, N), lambda r: (0, 0)),
        ],
        out_specs=pl.BlockSpec((TR, 128), lambda r: (r, 0)),
        compiler_params=pltpu.CompilerParams(
            # Each block writes only its own output rows -> safe to shard the
            # grid across TensorCores (v7x megacore); neutral on v5e/v6e.
            dimension_semantics=("parallel",),
            vmem_limit_bytes=vmem_limit,
        ),
    )(c, c_t, inv_row, inv_col)

    loss = jnp.sum(out[:, 0]) * jnp.float32(1.0 / N)
    return loss, ne_loss


def _reference(c_i, c_j, class_num, temperature):
    """Pure-JAX reference mirroring the PyTorch forward, for a sanity check."""
    K = class_num
    N = 2 * K
    p_i = c_i.sum(0)
    p_i = p_i / p_i.sum()
    ne_i = math.log(K) + (p_i * jnp.log(p_i)).sum()
    p_j = c_j.sum(0)
    p_j = p_j / p_j.sum()
    ne_j = math.log(K) + (p_j * jnp.log(p_j)).sum()
    ne_loss = ne_i + ne_j

    c = jnp.concatenate([c_i.T, c_j.T], axis=0)
    norm = jnp.sqrt(jnp.sum(c * c, axis=1))
    denom = jnp.maximum(norm[:, None] * norm[None, :], 1e-8)
    sim = (c @ c.T) / denom / temperature

    pair = jnp.concatenate([jnp.arange(K) + K, jnp.arange(K)])
    pos = sim[jnp.arange(N), pair]
    sim_m = jnp.where(jnp.eye(N, dtype=bool), -jnp.inf, sim)
    lse = jax.scipy.special.logsumexp(sim_m, axis=1)
    loss = jnp.sum(lse - pos) / N
    return loss, ne_loss


if __name__ == "__main__":
    class_num = 8
    batch = 16
    temperature = 0.5

    key = jax.random.PRNGKey(0)
    k1, k2 = jax.random.split(key)
    # cluster assignment probabilities (softmax outputs), as the module expects
    c_i = jax.nn.softmax(
        jax.random.normal(k1, (batch, class_num), dtype=jnp.float32), axis=1)
    c_j = jax.nn.softmax(
        jax.random.normal(k2, (batch, class_num), dtype=jnp.float32), axis=1)

    loss, ne_loss = intra_p_to_p(c_i, c_j, class_num, temperature)
    jax.block_until_ready((loss, ne_loss))

    ref_loss, ref_ne = _reference(c_i, c_j, class_num, temperature)
    assert np.allclose(float(loss), float(ref_loss), rtol=1e-4, atol=1e-4), (
        float(loss), float(ref_loss))
    assert np.allclose(float(ne_loss), float(ref_ne), rtol=1e-4, atol=1e-4), (
        float(ne_loss), float(ref_ne))

    print("KERNEL_OK")
</pallas_src>

<mosaic_0001>
module attributes {stable_mosaic.version = 11 : i64} {
  func.func @_intra_p_to_p_kernel(%arg0: i32, %arg1: memref<16x128xf32, #tpu.memory_space<vmem>>, %arg2: memref<128x16xf32, #tpu.memory_space<vmem>>, %arg3: memref<16x1xf32, #tpu.memory_space<vmem>>, %arg4: memref<1x16xf32, #tpu.memory_space<vmem>>, %arg5: memref<16x128xf32, #tpu.memory_space<vmem>>) attributes {dimension_semantics = [#tpu.dimension_semantics<parallel>], iteration_bounds = array<i64: 1>, scalar_prefetch = 0 : i64, scratch_operands = 0 : i64, tpu.core_type = #tpu.core_type<tc>, window_params = [{transform_indices = @transform_0, window_bounds = array<i64: 16, 128>}, {pipeline_mode = #tpu.pipeline_mode<synchronous>, transform_indices = @transform_1, window_bounds = array<i64: 128, 16>}, {transform_indices = @transform_2, window_bounds = array<i64: 16, 1>}, {pipeline_mode = #tpu.pipeline_mode<synchronous>, transform_indices = @transform_3, window_bounds = array<i64: 1, 16>}, {transform_indices = @transform_4, window_bounds = array<i64: 16, 128>}]} {
    %c0 = arith.constant 0 : index
    %c0_0 = arith.constant 0 : index
    %0 = vector.load %arg1[%c0, %c0_0] : memref<16x128xf32, #tpu.memory_space<vmem>>, vector<16x128xf32>
    %c0_1 = arith.constant 0 : index
    %c0_2 = arith.constant 0 : index
    %1 = vector.load %arg2[%c0_1, %c0_2] : memref<128x16xf32, #tpu.memory_space<vmem>>, vector<128x16xf32>
    %cst = arith.constant dense<0.000000e+00> : vector<16x16xf32>
    %2 = tpu.matmul %0, %1, %cst {dimension_numbers = #tpu.dot_dimension_numbers<[1], [0], [0], [1], [0, 0, 1, 1], [], []>} : vector<16x128xf32>, vector<128x16xf32>, vector<16x16xf32> -> vector<16x16xf32>
    %c0_3 = arith.constant 0 : index
    %c0_4 = arith.constant 0 : index
    %3 = vector.load %arg3[%c0_3, %c0_4] : memref<16x1xf32, #tpu.memory_space<vmem>>, vector<16x1xf32>
    %4 = vector.broadcast %3 : vector<16x1xf32> to vector<16x16xf32>
    %5 = arith.mulf %2, %4 : vector<16x16xf32>
    %c0_5 = arith.constant 0 : index
    %c0_6 = arith.constant 0 : index
    %6 = vector.load %arg4[%c0_5, %c0_6] : memref<1x16xf32, #tpu.memory_space<vmem>>, vector<1x16xf32>
    %7 = vector.broadcast %6 : vector<1x16xf32> to vector<16x16xf32>
    %8 = arith.mulf %5, %7 : vector<16x16xf32>
    %c16_i32 = arith.constant 16 : i32
    %9 = arith.muli %arg0, %c16_i32 : i32
    %10 = tpu.iota {dimensions = array<i32: 0>} : vector<16x1xi32>
    %11 = vector.broadcast %9 : i32 to vector<16x1xi32>
    %12 = arith.addi %11, %10 : vector<16x1xi32>
    %13 = tpu.iota {dimensions = array<i32: 1>} : vector<1x16xi32>
    %c8_i32 = arith.constant 8 : i32
    %14 = vector.broadcast %c8_i32 : i32 to vector<16x1xi32>
    %15 = arith.cmpi slt, %12, %14 : vector<16x1xi32>
    %c8_i32_7 = arith.constant 8 : i32
    %16 = vector.broadcast %c8_i32_7 : i32 to vector<16x1xi32>
    %17 = arith.addi %12, %16 : vector<16x1xi32>
    %c8_i32_8 = arith.constant 8 : i32
    %18 = vector.broadcast %c8_i32_8 : i32 to vector<16x1xi32>
    %19 = arith.subi %12, %18 : vector<16x1xi32>
    %20 = arith.select %15, %17, %19 : vector<16x1xi1>, vector<16x1xi32>
    %21 = vector.broadcast %13 : vector<1x16xi32> to vector<16x16xi32>
    %22 = vector.broadcast %20 : vector<16x1xi32> to vector<16x16xi32>
    %23 = arith.cmpi eq, %21, %22 : vector<16x16xi32>
    %cst_9 = arith.constant 0.000000e+00 : f32
    %24 = vector.broadcast %cst_9 : f32 to vector<16x16xf32>
    %25 = arith.select %23, %8, %24 : vector<16x16xi1>, vector<16x16xf32>
    %cst_10 = arith.constant dense<0.000000e+00> : vector<16xf32>
    %26 = vector.multi_reduction <add>, %25, %cst_10 [1] : vector<16x16xf32> to vector<16xf32>
    %27 = vector.shape_cast %26 : vector<16xf32> to vector<16x1xf32>
    %28 = vector.broadcast %12 : vector<16x1xi32> to vector<16x16xi32>
    %29 = vector.broadcast %13 : vector<1x16xi32> to vector<16x16xi32>
    %30 = arith.cmpi eq, %28, %29 : vector<16x16xi32>
    %cst_11 = arith.constant -1.000000e+30 : f32
    %31 = vector.broadcast %cst_11 : f32 to vector<16x16xf32>
    %32 = arith.select %30, %31, %8 : vector<16x16xi1>, vector<16x16xf32>
    %cst_12 = arith.constant dense<0xFF800000> : vector<16xf32>
    %33 = vector.multi_reduction <maximumf>, %32, %cst_12 [1] : vector<16x16xf32> to vector<16xf32>
    %34 = vector.shape_cast %33 : vector<16xf32> to vector<16x1xf32>
    %35 = vector.broadcast %34 : vector<16x1xf32> to vector<16x16xf32>
    %36 = arith.subf %32, %35 : vector<16x16xf32>
    %37 = math.exp %36 : vector<16x16xf32>
    %cst_13 = arith.constant dense<0.000000e+00> : vector<16xf32>
    %38 = vector.multi_reduction <add>, %37, %cst_13 [1] : vector<16x16xf32> to vector<16xf32>
    %39 = vector.shape_cast %38 : vector<16xf32> to vector<16x1xf32>
    %40 = math.log %39 : vector<16x1xf32>
    %41 = arith.addf %34, %40 : vector<16x1xf32>
    %42 = arith.subf %41, %27 : vector<16x1xf32>
    %43 = vector.shape_cast %42 : vector<16x1xf32> to vector<16x1xf32>
    %44 = vector.broadcast %43 : vector<16x1xf32> to vector<16x128xf32>
    %c0_14 = arith.constant 0 : index
    %c0_15 = arith.constant 0 : index
    %45 = vector.load %arg5[%c0_14, %c0_15] : memref<16x128xf32, #tpu.memory_space<vmem>>, vector<16x128xf32>
    tpu.vector_store %arg5[%c0_14, %c0_15], %44 {strides = array<i32>} : memref<16x128xf32, #tpu.memory_space<vmem>>, vector<16x128xf32>,
    return
  }
  func.func @transform_0(%arg0: i32) -> (i32, i32) {
    %c0_i32 = arith.constant 0 : i32
    %c0_i32_0 = arith.constant 0 : i32
    return %arg0, %c0_i32 : i32, i32
  }
  func.func @transform_1(%arg0: i32) -> (i32, i32) {
    %c0_i32 = arith.constant 0 : i32
    %c0_i32_0 = arith.constant 0 : i32
    %c0_i32_1 = arith.constant 0 : i32
    return %c0_i32, %c0_i32_0 : i32, i32
  }
  func.func @transform_2(%arg0: i32) -> (i32, i32) {
    %c0_i32 = arith.constant 0 : i32
    %c0_i32_0 = arith.constant 0 : i32
    return %arg0, %c0_i32 : i32, i32
  }
  func.func @transform_3(%arg0: i32) -> (i32, i32) {
    %c0_i32 = arith.constant 0 : i32
    %c0_i32_0 = arith.constant 0 : i32
    %c0_i32_1 = arith.constant 0 : i32
    return %c0_i32, %c0_i32_0 : i32, i32
  }
  func.func @transform_4(%arg0: i32) -> (i32, i32) {
    %c0_i32 = arith.constant 0 : i32
    %c0_i32_0 = arith.constant 0 : i32
    return %arg0, %c0_i32 : i32, i32
  }
}

</mosaic_0001>

<bundles_post_ra>
// kernel: tpu_custom_call.1
= control target key start
LH: loop header
LB: loop body
LE: loop exit
PB: predicated region body
PF: predicated region fallthrough
CT: control target
= control target key end

     0   :  { %v301_v2 = vmov 0   ;;  %s402_s0 = inlined_call_operand.vmem [shape: f32[16,128], index: 0, kind: input, shape index: {}]   ;;  %s403_s1 = inlined_call_operand.vmem [shape: f32[128,16], index: 1, kind: input, shape index: {}]   ;;  %s404_s2 = inlined_call_operand.vmem [shape: f32[16,1], index: 2, kind: input, shape index: {}]   ;;  %s405_s3 = inlined_call_operand.vmem [shape: f32[1,16], index: 3, kind: input, shape index: {}]   ;;  %s406_s4 = inlined_call_operand.hbm [shape: f32[16,128], index: 4, kind: output, shape index: {}]  }
   0x1   :  { %v35_v0 = vld [vmem:[%s403_s1 + $0x78] sm:$0xff]  ;;  %v34_v1 = vld [vmem:[%s403_s1 + $0x70] sm:$0xff]  ;;  %270 = vset.pattern.permute.xlu0 %v301_v2  ;;  %v33_v3 = vld [vmem:[%s403_s1 + $0x68] sm:$0xff] }
   0x2   :  { %231 = vmatprep.subr.mxu0 %v35_v0  ;;  %v32_v4 = vld [vmem:[%s403_s1 + $0x60] sm:$0xff]  ;;  %v31_v6 = vld [vmem:[%s403_s1 + $0x58] sm:$0xff] }
   0x3   :  { %232 = vmatpush3.msra.mxu0 %v35_v0  ;;  %v18_v5 = vld [vmem:[%s402_s0] sm:$0xff] }
   0x4   :  { %233 = vmatprep.subr.mxu0 %v34_v1  ;;  %263 = vmatprep.mubr.f32.mxu0 %v18_v5  ;;  %v111_v7 = vld [vmem:[%s404_s2] sm:$0xff] }
   0x5   :  { %234 = vmatpush3.msra.mxu0 %v34_v1 }
   0x6   :  { %235 = vmatprep.subr.mxu0 %v33_v3 }
   0x7   :  { %236 = vmatpush3.msra.mxu0 %v33_v3 }
   0x8   :  { %9 = vsyncpa [#allocation3], 0  ;;  %237 = vmatprep.subr.mxu0 %v32_v4  ;;  %115 = vperm.xlu0 %270, %v111_v7   ;;  %v30_v8 = vld [vmem:[%s403_s1 + $0x50] sm:$0xff]  ;;  %v112_v9 = vld [vmem:[%s404_s2 + $0x8] sm:$0xff]  ;;  %v135_v21 = vlaneseq  ;;  %vm155_vm4 = vcmask 130048  }
   0x9   :  { %238 = vmatpush3.msra.mxu0 %v32_v4  ;;  %v29_v10 = vld [vmem:[%s403_s1 + $0x48] sm:$0xff]  ;;  %v28_v11 = vld [vmem:[%s403_s1 + $0x40] sm:$0xff]  ;;  %v27_v12 = vld [vmem:[%s403_s1 + $0x38] sm:$0xff] }
   0xa   :  { %239 = vmatprep.subr.mxu0 %v31_v6  ;;  %v26_v13 = vld [vmem:[%s403_s1 + $0x30] sm:$0xff]  ;;  %v25_v14 = vld [vmem:[%s403_s1 + $0x28] sm:$0xff]  ;;  %v24_v15 = vld [vmem:[%s403_s1 + $0x20] sm:$0xff]  ;;  %v136_v22 = vshrl.u32 %v135_v21, 7  ;;  %v142_v24 = vand.u32 127, %v135_v21 }
   0xb   :  { %240 = vmatpush3.msra.mxu0 %v31_v6  ;;  %v23_v16 = vld [vmem:[%s403_s1 + $0x18] sm:$0xff]  ;;  %v22_v17 = vld [vmem:[%s403_s1 + $0x10] sm:$0xff]  ;;  %v21_v18 = vld [vmem:[%s403_s1 + $0x8] sm:$0xff] }
   0xc   :  { %241 = vmatprep.subr.mxu0 %v30_v8  ;;  %120 = vperm.xlu0 %270, %v112_v9   ;;  %v20_v19 = vld [vmem:[%s403_s1] sm:$0xff]  ;;  %v19_v20 = vld [vmem:[%s402_s0 + $0x8] sm:$0xff]  ;;  %v137_v23 = vadd.s32 8, %v136_v22  ;;  %vm162_vm2 = vcmp.eq.s32.totalorder %v136_v22, %v142_v24  ;;  %s302_s0 = smov [#allocation2]  }
   0xd   :  { %242 = vmatpush3.msra.mxu0 %v30_v8  ;;  %v210_v29 = vld [vmem:[%s405_s3] ss:$0 sm:$0xff]  ;;  %s199_s3 = sshll.u32 %s302_s0, 4  ;;  %s200_s3 = int_to_ptr.vmem [resolvable:$true] %s199_s3 }
   0xe   :  { %243 = vmatprep.subr.mxu0 %v29_v10  ;;  %v212_v25 = vadd.s32 4294967288, %v137_v23  ;;  %vm151_vm1 = vcmp.eq.s32.totalorder %v142_v24, %v137_v23  ;;  %vm163_vm3 = vcmp.eq.s32.totalorder %v137_v23, %v142_v24  ;;  %s279_s29 = scalar_lea.vmem %s200_s3, 256  ;;  %p284_p1 = scmp.lt.s32.totalorder %s200_s3, %s200_s3 }
   0xf   :  { %244 = vmatpush3.msra.mxu0 %v29_v10  ;;  %p280_p0 = scmp.ne.s32.totalorder %s200_s3, %s279_s29  ;;  %p285_p2 = scmp.lt.s32.totalorder %s279_s29, %s279_s29 }
  0x10   :  { %245 = vmatprep.subr.mxu0 %v28_v11  ;;  %vm152_vm0 = vcmp.eq.s32.totalorder %v142_v24, %v212_v25 }
  0x11   :  { %246 = vmatpush3.msra.mxu0 %v28_v11  ;;  %p286_p3 = por %p285_p2, %p284_p1 }
  0x12   :  { %247 = vmatprep.subr.mxu0 %v27_v12 }
  0x13   :  { %248 = vmatpush3.msra.mxu0 %v27_v12  ;;  %p287_p4 = pnand %p286_p3, %p280_p0 }
  0x14   :  { %249 = vmatprep.subr.mxu0 %v26_v13 }
  0x15   :  { %250 = vmatpush3.msra.mxu0 %v26_v13 }
  0x16   :  { %251 = vmatprep.subr.mxu0 %v25_v14 }
  0x17   :  { %252 = vmatpush3.msra.mxu0 %v25_v14 }
  0x18   :  { %253 = vmatprep.subr.mxu0 %v24_v15 }
  0x19   :  { %254 = vmatpush3.msra.mxu0 %v24_v15 }
  0x1a   :  { %255 = vmatprep.subr.mxu0 %v23_v16 }
  0x1b   :  { %256 = vmatpush3.msra.mxu0 %v23_v16 }
  0x1c   :  { %257 = vmatprep.subr.mxu0 %v22_v17 }
  0x1d   :  { %258 = vmatpush3.msra.mxu0 %v22_v17 }
  0x1e   :  { %259 = vmatprep.subr.mxu0 %v21_v18 }
  0x1f   :  { %260 = vmatpush3.msra.mxu0 %v21_v18 }
  0x20   :  { %261 = vmatprep.subr.mxu0 %v20_v19 }
  0x21   :  { %262 = vmatpush3.msra.mxu0 %v20_v19 }
  0x22   :  { %264 = vmatmul.mubr.f32.vlgmr.msra.gmra.mxu0 %v19_v20 }
  0x83   :  { %v116_v26 = vpop.permute.xlu0 %115 }
  0x87   :  { %v121_v27 = vpop.permute.xlu0 %120 }
  0xe2   :  { %v265_v28 = vpop.f32.mrf.mxu0 }
  0xe3   :  { %v124_v30 = vmul.f32 %v265_v28, %v121_v27 }
  0xe4   :  { %v102_v31 = vpop.f32.mrf.mxu0 }
  0xe5   :  { %v133_v32 = vmul.f32 %v210_v29, %v124_v30  ;;  %v123_v33 = vmul.f32 %v116_v26, %v102_v31 }
  0xe7   :  { %v132_v34 = vmul.f32 %v210_v29, %v123_v33  ;;  %v154_v35 = vsel %vm152_vm0, %v133_v32, 0.0  ;;  %v165_v39 = vsel %vm163_vm3, -1e+30, %v133_v32 }
  0xe8   :  { %v169_v40 = vsel %vm155_vm4, %v165_v39, -inf  ;;  %v159_v52 = vsel %vm155_vm4, %v154_v35, 0.0 }
  0xe9   :  { %v164_v36 = vsel %vm162_vm2, -1e+30, %v132_v34  ;;  %v153_v37 = vsel %vm151_vm1, %v132_v34, 0.0 }
  0xea   :  { %v166_v38 = vsel %vm155_vm4, %v164_v36, -inf  ;;  %v156_v51 = vsel %vm155_vm4, %v153_v37, 0.0 }
  0xeb   :  { %167 = vmax.xlane.f32.xlu1 %v166_v38 }
  0xef   :  { %170 = vmax.xlane.f32.xlu1 %v169_v40 }
 0x174   :  { %v168_v41 = vpop.xlane.xlu1 %167 }
 0x175   :  { %v172_v42 = vsub.f32 %v164_v36, %v168_v41 }
 0x177   :  { %v174_v43 = vmul.f32 1.442695, %v172_v42 }
 0x178   :  { %v171_v44 = vpop.xlane.xlu1 %170 }
 0x179   :  { %271 = vpow2.f32 %v174_v43  ;;  %v173_v45 = vsub.f32 %v165_v39, %v171_v44 }
 0x17b   :  { %v176_v46 = vmul.f32 1.442695, %v173_v45 }
 0x17d   :  { %273 = vpow2.f32 %v176_v46 }
 0x186   :  { %v272_v47 = vpop.eup %271 }
 0x187   :  { %v178_v48 = vsel %vm155_vm4, %v272_v47, 0.0 }
 0x188   :  { %179 = vadd.xlane.f32.xlu0 %v178_v48 }
 0x18a   :  { %v274_v49 = vpop.eup %273 }
 0x18b   :  { %v181_v50 = vsel %vm155_vm4, %v274_v49, 0.0 }
 0x18c   :  { %182 = vadd.xlane.f32.xlu1 %v181_v50 }
 0x190   :  { %157 = vadd.xlane.f32.xlu1 %v156_v51 }
 0x194   :  { %160 = vadd.xlane.f32.xlu1 %v159_v52 }
 0x211   :  { %v180_v53 = vpop.xlane.xlu0 %179 }
 0x212   :  { %275 = vlog2.f32 %v180_v53 }
 0x215   :  { %v183_v54 = vpop.xlane.xlu1 %182 }
 0x216   :  { %277 = vlog2.f32 %v183_v54 }
 0x219   :  { %v158_v57 = vpop.xlane.xlu1 %157 }
 0x21d   :  { %v161_v63 = vpop.xlane.xlu1 %160 }
 0x21f   :  { %v276_v55 = vpop.eup %275 }
 0x220   :  { %v185_v56 = vmul.f32 0.6931472, %v276_v55 }
 0x222   :  { %v188_v58 = vadd.f32 %v185_v56, %v168_v41 }
 0x223   :  { %v278_v59 = vpop.eup %277 }
 0x224   :  { %v187_v60 = vmul.f32 0.6931472, %v278_v59  ;;  %v190_v61 = vsub.f32 %v188_v58, %v158_v57 }
 0x226   :  { %192 = vst [vmem:[#allocation2] sm:$0xff] %v190_v61  ;;  %v189_v62 = vadd.f32 %v187_v60, %v171_v44 }
 0x228   :  { %v191_v0 = vsub.f32 %v189_v62, %v161_v63 }
 0x22a   :  { %193 = vst [vmem:[#allocation2 + $0x8] sm:$0xff] %v191_v0 }
 0x22b   :  { %290 = shalt.err (!%p287_p4)
}
 0x22c   :  { %s303_s30 = smov 128   ;;  %s304_s5 = smov 8  }
 0x22d   :  { %205 = dma.vmem_to_hbm [thread:$0]  %s200_s3, 256, %s406_s4, [#allocation3], %s303_s30, %s303_s30, %s304_s5  }
 0x22e   :  { %299 = dma.done.wait [#allocation3], 256  }
 0x22f   :  { %300 = vsyncadd [#allocation3], 4294967040 }
 0x230   :  { %209 = vsyncpa [#allocation3], 1 }

</bundles_post_ra>
